<compile_context>
chip_gen: v5e
topology: v5e:2x2
jax: 0.10.0
libtpu: 0.0.40
codegen_flags: <defaults>
</compile_context>

<pallas_src>
import jax
import jax.numpy as jnp
from jax.experimental import pallas as pl
from jax.experimental.pallas import tpu as pltpu


def _round_up(v, m):
    return ((v + m - 1) // m) * m


def _pick_tile(extent, pref, align):
    """Pick (tile, padded_extent): tile is a multiple of `align`, at most
    max(pref, align), and minimizes zero-padding of `extent` to a tile multiple."""
    pref = max(_round_up(pref, align), align)
    ext_a = _round_up(extent, align)
    if ext_a <= pref:
        return ext_a, ext_a
    best_tile, best_pad = align, None
    t = pref
    while t >= align:
        pad = _round_up(extent, t) - extent
        if best_pad is None or pad < best_pad:
            best_tile, best_pad = t, pad
            if pad == 0:
                break
        t -= align
    return best_tile, _round_up(extent, best_tile)


# --------------------------------------------------------------------------------------
# Kernels
# --------------------------------------------------------------------------------------
def _parallel_sum_kernel_single(x_ref, w_ref, b_ref, o_ref):
    # Fast path: K_eff == 1 and the whole contraction fits one chunk.
    # x_ref: [TM, TK]   w_ref: [1, TK, TN]   b_ref: [1, TN]   o_ref: [TM, TN]
    acc = jnp.dot(x_ref[...], w_ref[0], preferred_element_type=jnp.float32)
    o_ref[...] = (acc + b_ref[...].astype(jnp.float32)).astype(o_ref.dtype)


def _parallel_sum_kernel_reduce(x_ref, w_ref, b_ref, o_ref, acc_ref):
    # grid = (M_tiles, N_tiles, R) with R = K_branches * H_in_chunks (the last,
    # "arbitrary" axis).  acc_ref is a VMEM f32 accumulator tile resident across R.
    r = pl.program_id(2)

    @pl.when(r == 0)
    def _init():
        acc_ref[...] = jnp.zeros_like(acc_ref)

    acc_ref[...] += jnp.dot(x_ref[...], w_ref[0], preferred_element_type=jnp.float32)

    @pl.when(r == pl.num_programs(2) - 1)
    def _finalize():
        # Bias (pre-summed over branches in the wrapper) is added once per tile.
        o_ref[...] = (acc_ref[...] + b_ref[...].astype(jnp.float32)).astype(o_ref.dtype)


# --------------------------------------------------------------------------------------
# Wrapper
# --------------------------------------------------------------------------------------
def parallel_sum(x, weights, biases, *, fold_branches=True, compute_dtype=None,
                 tile_m=None, tile_n=256, tile_k=512):
    """sum_k ( x @ weights[k] + biases[k] ) computed in one tiled Pallas TPU kernel.

    x:        [B, S, H_in]
    weights:  [K, H_in, H_out]
    biases:   [K, H_out]
    returns:  [B, S, H_out]

    fold_branches : exploit linearity (sum_k x@W[k]+b[k] == x @ sum_k W[k] + sum_k b[k])
                    and pre-reduce the weights over K -> Kx fewer matmuls and Kx less
                    weight HBM traffic.  Only the fp summation order differs from the
                    unfolded path (accuracy/perf trade-off).
    compute_dtype : MXU input dtype.  bf16 is native on v5e/v6e/v7x (~4x f32-equivalent
                    throughput, half the HBM/VMEM footprint); accumulation stays f32.
                    None keeps x.dtype.
    """
    B, S, H_in = x.shape
    K, H_in_w, H_out = weights.shape
    assert H_in_w == H_in and biases.shape == (K, H_out)
    M = B * S
    out_dtype = x.dtype
    cdt = jnp.dtype(compute_dtype) if compute_dtype is not None else jnp.dtype(x.dtype)

    # Bias is linear under '+', so it is always hoisted out of the branch loop.
    b_sum = jnp.sum(biases.astype(jnp.float32), axis=0).reshape(1, H_out)

    if fold_branches:
        # Weights summed in f32 for accuracy, then cast back to the compute dtype so a
        # bf16 input keeps the native (fast) MXU path.
        weights = jnp.sum(weights.astype(jnp.float32), axis=0, keepdims=True)
        K = 1
    weights = weights.astype(cdt)
    x2d = x.reshape(M, H_in).astype(cdt)

    itemsz = cdt.itemsize
    out_sz = jnp.dtype(out_dtype).itemsize

    # ---- per-generation VMEM budget ----------------------------------------------
    try:
        vmem_cap = int(getattr(pltpu.get_tpu_info(), "vmem_capacity_bytes", 64 << 20))
    except Exception:  # conservative fallback == v7x per-TC capacity
        vmem_cap = 64 << 20
    if tile_m is None:
        # Bigger M tiles halve weight re-streaming; only where VMEM is plentiful
        # (v5e/v6e: 128 MiB).  On v7x (64 MiB) stay at 256.
        tile_m = 512 if vmem_cap >= (100 << 20) else 256

    # ---- tile selection (lane/sublane aligned; operands zero-padded to multiples) --
    m_align = max(8, 32 // min(itemsz, out_sz))
    tn_pref, tk_pref = tile_n, tile_k
    if K == 1:
        # Weight-residency heuristic: if the whole (padded) weight panel, double
        # buffered, plus x/out tiles fit comfortably, make the W block grid-invariant
        # so the weight is DMA'd from HBM exactly once.
        tk_full = _round_up(H_in, 128)
        tn_full = _round_up(H_out, 128)
        tm_guess = min(_round_up(tile_m, m_align), _round_up(M, m_align))
        need_full = (2 * tk_full * tn_full * itemsz
                     + 2 * tm_guess * tk_full * itemsz
                     + 2 * tm_guess * tn_full * out_sz
                     + 2 * tn_full * 4)
        if need_full <= int(0.45 * vmem_cap):
            tk_pref, tn_pref = tk_full, tn_full

    TM, M_pad = _pick_tile(M, tile_m, m_align)
    TN, H_out_pad = _pick_tile(H_out, tn_pref, 128)   # always lane-dense output
    TK, H_in_pad = _pick_tile(H_in, tk_pref, 128)     # bounded contraction chunk

    n_kc = H_in_pad // TK            # contraction chunks per branch
    R = K * n_kc                     # trailing reduction extent (branches x chunks)
    m_t = M_pad // TM
    n_t = H_out_pad // TN

    # ---- zero-pad operands (zeros are exact under matmul and '+') -------------------
    if (M_pad, H_in_pad) != (M, H_in):
        x2d = jnp.pad(x2d, ((0, M_pad - M), (0, H_in_pad - H_in)))
    if (H_in_pad, H_out_pad) != (H_in, H_out):
        weights = jnp.pad(weights, ((0, 0), (0, H_in_pad - H_in), (0, H_out_pad - H_out)))
    if H_out_pad != H_out:
        b_sum = jnp.pad(b_sum, ((0, 0), (0, H_out_pad - H_out)))

    # ---- VMEM limit: double-buffered pipeline footprint, capped at ~75% physical ----
    need = (2 * (TM * TK * itemsz + TK * TN * itemsz + TN * 4 + TM * TN * out_sz)
            + (TM * TN * 4 if R > 1 else 0))
    vmem_limit = min(int(0.75 * vmem_cap), max(2 * need, 32 << 20))
    vmem_limit = int(max(vmem_limit, need + (4 << 20)))

    cost = pl.CostEstimate(
        flops=2 * M_pad * H_in_pad * H_out_pad * K,
        transcendentals=0,
        bytes_accessed=(n_t * M_pad * H_in_pad * itemsz            # x read per N tile
                        + m_t * K * H_in_pad * H_out_pad * itemsz  # W read per M tile
                        + M_pad * H_out_pad * out_sz
                        + H_out_pad * 4),
    )

    if R == 1:
        # Fast path: no accumulator scratch, no init/finalize RMW traffic.
        kernel = _parallel_sum_kernel_single
        dims = ("parallel", "parallel")
        grid_spec = pltpu.PrefetchScalarGridSpec(
            num_scalar_prefetch=0,
            grid=(m_t, n_t),
            in_specs=[
                pl.BlockSpec((TM, TK), lambda i, j: (i, 0)),
                pl.BlockSpec((1, TK, TN), lambda i, j: (0, 0, j)),
                pl.BlockSpec((1, TN), lambda i, j: (0, j)),
            ],
            out_specs=pl.BlockSpec((TM, TN), lambda i, j: (i, j)),
        )
    else:
        # General path: reduce over branches x H_in chunks in a VMEM f32 accumulator.
        kernel = _parallel_sum_kernel_reduce
        dims = ("parallel", "parallel", "arbitrary")
        grid_spec = pltpu.PrefetchScalarGridSpec(
            num_scalar_prefetch=0,
            grid=(m_t, n_t, R),
            in_specs=[
                # x chunk: varies with M tile and H_in chunk, constant across branches.
                pl.BlockSpec((TM, TK), lambda i, j, r: (i, r % n_kc)),
                # W chunk: streamed along the (branch, H_in chunk) reduction axis.
                pl.BlockSpec((1, TK, TN), lambda i, j, r: (r // n_kc, r % n_kc, j)),
                # summed bias: tiny, constant per N tile.
                pl.BlockSpec((1, TN), lambda i, j, r: (0, j)),
            ],
            out_specs=pl.BlockSpec((TM, TN), lambda i, j, r: (i, j)),
            scratch_shapes=[pltpu.VMEM((TM, TN), jnp.float32)],
        )
        # NOTE: on v7x (2 TCs) megacore sharding needs m_t * n_t >= 2; tiny demo grids
        # may leave one TensorCore idle.

    out2d = pl.pallas_call(
        kernel,
        out_shape=jax.ShapeDtypeStruct((M_pad, H_out_pad), out_dtype),
        grid_spec=grid_spec,
        compiler_params=pltpu.CompilerParams(
            dimension_semantics=dims,
            vmem_limit_bytes=vmem_limit,
        ),
        cost_estimate=cost,
    )(x2d, weights, b_sum)

    return out2d[:M, :H_out].reshape(B, S, H_out)


# --------------------------------------------------------------------------------------
# Demo / correctness check
# --------------------------------------------------------------------------------------
if __name__ == "__main__":
    key = jax.random.PRNGKey(0)
    kx, kw, kb, kx2, kw2, kb2 = jax.random.split(key, 6)

    # Canonical small instantiation: K=3 parallel Linear(32, 32) branches,
    # x: [batch=2, seq=8, hidden=32].
    B, S, H, K = 2, 8, 32, 3
    x = jax.random.normal(kx, (B, S, H), dtype=jnp.float32)
    bound = 1.0 / (H ** 0.5)   # torch.nn.Linear default init range
    weights = jax.random.uniform(kw, (K, H, H), jnp.float32, -bound, bound)
    biases = jax.random.uniform(kb, (K, H), jnp.float32, -bound, bound)

    # Pure-JAX reference: ParallelSum semantics (sum of branch outputs).
    ref = sum(x @ weights[k] + biases[k] for k in range(K))

    # Fast path: weights folded via linearity (single matmul, no accumulator scratch).
    out_folded = jax.block_until_ready(
        parallel_sum(x, weights, biases, fold_branches=True))
    # General path: per-branch reduction over the trailing grid axis.
    out_branch = jax.block_until_ready(
        parallel_sum(x, weights, biases, fold_branches=False))

    assert out_folded.shape == (B, S, H)
    assert out_branch.shape == (B, S, H)
    assert jnp.allclose(out_folded, ref, atol=1e-4, rtol=1e-4)
    assert jnp.allclose(out_branch, ref, atol=1e-4, rtol=1e-4)

    # Ragged shapes (non-multiples of 8 / 128) exercise the zero-padding +
    # multi-step reduction path.
    B2, S2, Hi2, Ho2, K2 = 2, 5, 48, 40, 3
    x2 = jax.random.normal(kx2, (B2, S2, Hi2), dtype=jnp.float32)
    w2 = 0.1 * jax.random.normal(kw2, (K2, Hi2, Ho2), dtype=jnp.float32)
    b2 = 0.1 * jax.random.normal(kb2, (K2, Ho2), dtype=jnp.float32)
    ref2 = sum(x2 @ w2[k] + b2[k] for k in range(K2))
    out2 = jax.block_until_ready(parallel_sum(x2, w2, b2, fold_branches=False))
    assert out2.shape == (B2, S2, Ho2)
    assert jnp.allclose(out2, ref2, atol=1e-4, rtol=1e-4)

    print("KERNEL_OK")
</pallas_src>

<mosaic_0001>
module attributes {stable_mosaic.version = 11 : i64} {
  func.func @_parallel_sum_kernel_single(%arg0: i32, %arg1: i32, %arg2: memref<16x128xf32, #tpu.memory_space<vmem>>, %arg3: memref<1x128x128xf32, #tpu.memory_space<vmem>>, %arg4: memref<1x128xf32, #tpu.memory_space<vmem>>, %arg5: memref<16x128xf32, #tpu.memory_space<vmem>>) attributes {dimension_semantics = [#tpu.dimension_semantics<parallel>, #tpu.dimension_semantics<parallel>], iteration_bounds = array<i64: 1, 1>, scalar_prefetch = 0 : i64, scratch_operands = 0 : i64, tpu.core_type = #tpu.core_type<tc>, window_params = [{transform_indices = @transform_0, window_bounds = array<i64: 16, 128>}, {transform_indices = @transform_1, window_bounds = array<i64: 1, 128, 128>}, {transform_indices = @transform_2, window_bounds = array<i64: 1, 128>}, {transform_indices = @transform_3, window_bounds = array<i64: 16, 128>}]} {
    %c0 = arith.constant 0 : index
    %c0_0 = arith.constant 0 : index
    %0 = vector.load %arg2[%c0, %c0_0] : memref<16x128xf32, #tpu.memory_space<vmem>>, vector<16x128xf32>
    %c0_1 = arith.constant 0 : index
    %c0_2 = arith.constant 0 : index
    %c0_3 = arith.constant 0 : index
    %1 = vector.load %arg3[%c0_1, %c0_2, %c0_3] : memref<1x128x128xf32, #tpu.memory_space<vmem>>, vector<1x128x128xf32>
    %2 = vector.shape_cast %1 : vector<1x128x128xf32> to vector<128x128xf32>
    %cst = arith.constant dense<0.000000e+00> : vector<16x128xf32>
    %3 = tpu.matmul %0, %2, %cst {dimension_numbers = #tpu.dot_dimension_numbers<[1], [0], [0], [1], [0, 0, 1, 1], [], []>} : vector<16x128xf32>, vector<128x128xf32>, vector<16x128xf32> -> vector<16x128xf32>
    %c0_4 = arith.constant 0 : index
    %c0_5 = arith.constant 0 : index
    %4 = vector.load %arg4[%c0_4, %c0_5] : memref<1x128xf32, #tpu.memory_space<vmem>>, vector<1x128xf32>
    %5 = vector.broadcast %4 : vector<1x128xf32> to vector<16x128xf32>
    %6 = arith.addf %3, %5 : vector<16x128xf32>
    %c0_6 = arith.constant 0 : index
    %c0_7 = arith.constant 0 : index
    %7 = vector.load %arg5[%c0_6, %c0_7] : memref<16x128xf32, #tpu.memory_space<vmem>>, vector<16x128xf32>
    tpu.vector_store %arg5[%c0_6, %c0_7], %6 {strides = array<i32>} : memref<16x128xf32, #tpu.memory_space<vmem>>, vector<16x128xf32>,
    return
  }
  func.func @transform_0(%arg0: i32, %arg1: i32) -> (i32, i32) {
    %c0_i32 = arith.constant 0 : i32
    %c0_i32_0 = arith.constant 0 : i32
    return %arg0, %c0_i32 : i32, i32
  }
  func.func @transform_1(%arg0: i32, %arg1: i32) -> (i32, i32, i32) {
    %c0_i32 = arith.constant 0 : i32
    %c0_i32_0 = arith.constant 0 : i32
    %c0_i32_1 = arith.constant 0 : i32
    return %c0_i32, %c0_i32_0, %arg1 : i32, i32, i32
  }
  func.func @transform_2(%arg0: i32, %arg1: i32) -> (i32, i32) {
    %c0_i32 = arith.constant 0 : i32
    %c0_i32_0 = arith.constant 0 : i32
    return %c0_i32, %arg1 : i32, i32
  }
  func.func @transform_3(%arg0: i32, %arg1: i32) -> (i32, i32) {
    %c0_i32 = arith.constant 0 : i32
    return %arg0, %arg1 : i32, i32
  }
}

</mosaic_0001>

<bundles_post_ra>
// kernel: tpu_custom_call.1
= control target key start
LH: loop header
LB: loop body
LE: loop exit
PB: predicated region body
PF: predicated region fallthrough
CT: control target
= control target key end

     0   :  { %8 = vsyncpa [#allocation3], 0  ;;  %s260_s0 = inlined_call_operand.hbm [shape: f32[16,128], index: 0, kind: input, shape index: {}]   ;;  %s261_s1 = inlined_call_operand.hbm [shape: f32[1,128,128], index: 1, kind: input, shape index: {}]   ;;  %s262_s2 = inlined_call_operand.vmem [shape: f32[1,128], index: 2, kind: input, shape index: {}]   ;;  %s263_s3 = inlined_call_operand.hbm [shape: f32[16,128], index: 3, kind: output, shape index: {}]  }
   0x1   :  { %9 = vsyncpa [#allocation6], 0 }
   0x2   :  { %10 = vsyncpa [#allocation4], 0  ;;  %s15_s14 = sshll.u32 %s260_s0, 4  ;;  %s214_s15 = smov [#allocation2]   ;;  %s16_s14 = int_to_ptr.hbm [resolvable:$true] %s15_s14 }
   0x3   :  { %s17_s16 = sshll.u32 %s214_s15, 4  ;;  %s28_s19 = sshll.u32 %s261_s1, 4  ;;  %s18_s16 = int_to_ptr.vmem [resolvable:$true] %s17_s16  ;;  %s29_s19 = int_to_ptr.hbm [resolvable:$true] %s28_s19 }
   0x4   :  { %s215_s20 = smov 128   ;;  %s216_s21 = smov 8  }
   0x5   :  { %23 = dma.hbm_to_vmem [thread:$0]  %s16_s14, 256, %s18_s16, [#allocation3], %s215_s20, %s215_s20, %s216_s21  }
   0x6   :  { %s217_s22 = smov [#allocation5]  }
   0x7   :  { %s30_s23 = sshll.u32 %s217_s22, 4  ;;  %s31_s23 = int_to_ptr.vmem [resolvable:$true] %s30_s23 }
   0x8   :  { %36 = dma.hbm_to_vmem [thread:$0]  %s29_s19, 2048, %s31_s23, [#allocation6], %s215_s20, %s215_s20, %s216_s21  }
   0x9   :  { %208 = dma.done.wait [#allocation3], 256  }
   0xa   :  { %209 = vsyncadd [#allocation3], 4294967040 }
   0xb   :  { %210 = dma.done.wait [#allocation6], 2048  }
   0xc   :  { %211 = vsyncadd [#allocation6], 4294965248  ;;  %v64_v0 = vld [vmem:[#allocation5 + $0x78] sm:$0xff]  ;;  %v63_v1 = vld [vmem:[#allocation5 + $0x70] sm:$0xff]  ;;  %s218_s24 = smov [#allocation7]   ;;  %s100_s28 = sshll.u32 %s263_s3, 4  ;;  %s101_s28 = int_to_ptr.hbm [resolvable:$true] %s100_s28 }
   0xd   :  { %69 = vmatpush.msra.mxu0 %v64_v0  ;;  %114 = vmatpush.msra.mxu1 %v64_v0  ;;  %v62_v2 = vld [vmem:[#allocation5 + $0x68] sm:$0xff]  ;;  %v61_v3 = vld [vmem:[#allocation5 + $0x60] sm:$0xff]  ;;  %v60_v4 = vld [vmem:[#allocation5 + $0x58] sm:$0xff]  ;;  %s98_s25 = sshll.u32 %s218_s24, 4  ;;  %s99_s25 = int_to_ptr.vmem [resolvable:$true] %s98_s25 }
   0xe   :  { %v59_v5 = vld [vmem:[#allocation5 + $0x50] sm:$0xff]  ;;  %v58_v6 = vld [vmem:[#allocation5 + $0x48] sm:$0xff]  ;;  %v57_v7 = vld [vmem:[#allocation5 + $0x40] sm:$0xff] }
   0xf   :  { %70 = vmatpush.msra.mxu0 %v63_v1  ;;  %115 = vmatpush.msra.mxu1 %v63_v1  ;;  %v56_v8 = vld [vmem:[#allocation5 + $0x38] sm:$0xff]  ;;  %v55_v9 = vld [vmem:[#allocation5 + $0x30] sm:$0xff]  ;;  %v54_v10 = vld [vmem:[#allocation5 + $0x28] sm:$0xff] }
  0x10   :  { %v53_v11 = vld [vmem:[#allocation5 + $0x20] sm:$0xff]  ;;  %v52_v12 = vld [vmem:[#allocation5 + $0x18] sm:$0xff]  ;;  %v51_v13 = vld [vmem:[#allocation5 + $0x10] sm:$0xff] }
  0x11   :  { %71 = vmatpush.msra.mxu0 %v62_v2  ;;  %116 = vmatpush.msra.mxu1 %v62_v2  ;;  %v50_v14 = vld [vmem:[#allocation5 + $0x8] sm:$0xff]  ;;  %v49_v15 = vld [vmem:[#allocation5] sm:$0xff]  ;;  %v47_v16 = vld [vmem:[#allocation2] sm:$0xff] }
  0x12   :  { %v48_v17 = vld [vmem:[#allocation2 + $0x8] sm:$0xff]  ;;  %v135_v18 = vld [vmem:[%s262_s2] ss:$0 sm:$0xff] }
  0x13   :  { %72 = vmatpush.msra.mxu0 %v61_v3  ;;  %117 = vmatpush.msra.mxu1 %v61_v3 }
  0x15   :  { %73 = vmatpush.msra.mxu0 %v60_v4  ;;  %118 = vmatpush.msra.mxu1 %v60_v4 }
  0x17   :  { %74 = vmatpush.msra.mxu0 %v59_v5  ;;  %119 = vmatpush.msra.mxu1 %v59_v5 }
  0x19   :  { %75 = vmatpush.msra.mxu0 %v58_v6  ;;  %120 = vmatpush.msra.mxu1 %v58_v6 }
  0x1b   :  { %76 = vmatpush.msra.mxu0 %v57_v7  ;;  %121 = vmatpush.msra.mxu1 %v57_v7 }
  0x1d   :  { %77 = vmatpush.msra.mxu0 %v56_v8  ;;  %122 = vmatpush.msra.mxu1 %v56_v8 }
  0x1f   :  { %78 = vmatpush.msra.mxu0 %v55_v9  ;;  %123 = vmatpush.msra.mxu1 %v55_v9 }
  0x21   :  { %79 = vmatpush.msra.mxu0 %v54_v10  ;;  %124 = vmatpush.msra.mxu1 %v54_v10 }
  0x23   :  { %80 = vmatpush.msra.mxu0 %v53_v11  ;;  %125 = vmatpush.msra.mxu1 %v53_v11 }
  0x25   :  { %81 = vmatpush.msra.mxu0 %v52_v12  ;;  %126 = vmatpush.msra.mxu1 %v52_v12 }
  0x27   :  { %82 = vmatpush.msra.mxu0 %v51_v13  ;;  %127 = vmatpush.msra.mxu1 %v51_v13 }
  0x29   :  { %83 = vmatpush.msra.mxu0 %v50_v14  ;;  %128 = vmatpush.msra.mxu1 %v50_v14 }
  0x2b   :  { %84 = vmatpush.msra.mxu0 %v49_v15  ;;  %129 = vmatpush.msra.mxu1 %v49_v15 }
  0x2c   :  { %85 = vmatmul.f32.vlgmr.msra.gmra.mxu0 %v47_v16  ;;  %88 = vmatmul.f32.vlgmr.msra.gmra.mxu1 %v48_v17 }
  0xa9   :  { %v86_v19 = vpop.f32.mrf.mxu0  ;;  %v89_v20 = vpop.f32.mrf.mxu1 }
  0xaa   :  { %v87_v21 = vadd.f32 %v135_v18, %v86_v19  ;;  %v90_v22 = vadd.f32 %v135_v18, %v89_v20 }
  0xac   :  { %92 = vst [vmem:[#allocation7] sm:$0xff] %v87_v21 }
  0xad   :  { %93 = vst [vmem:[#allocation7 + $0x8] sm:$0xff] %v90_v22 }
  0xae   :  { %106 = dma.vmem_to_hbm [thread:$0]  %s99_s25, 256, %s101_s28, [#allocation4], %s215_s20, %s215_s20, %s216_s21  }
  0xaf   :  { %212 = dma.done.wait [#allocation4], 256  }
  0xb0   :  { %213 = vsyncadd [#allocation4], 4294967040 }
  0xb1   :  { %111 = vsyncpa [#allocation3], 1 }
  0xb2   :  { %112 = vsyncpa [#allocation6], 1 }
  0xb3   :  { %113 = vsyncpa [#allocation4], 1 }

</bundles_post_ra>
